<compile_context>
chip_gen: v6e
topology: v6e:2x2x1
jax: 0.10.0
libtpu: 0.0.40
codegen_flags: <defaults>
</compile_context>

<pallas_src>
import functools

import jax
import jax.numpy as jnp
from jax.experimental import pallas as pl
from jax.experimental.pallas import tpu as pltpu

_LANE = 128
_SUBLANE = 8


def _round_up(x, m):
    return (x + m - 1) // m * m


def _fused_mlp_kernel(x_ref, w_ref, b_ref, o_ref):
    # Single MXU pass (f32 accumulate) + bias broadcast (VPU) + tanh (EUP).
    y = jnp.dot(x_ref[...], w_ref[...], preferred_element_type=jnp.float32)
    o_ref[...] = jnp.tanh(y + b_ref[...]).astype(o_ref.dtype)


def prepare_fused_params(w1, b1, w2, b2):
    """Fuse the two linears (valid: no nonlinearity between fc1 and fc2) and
    zero-pad the feature dims to 128 lanes. Done once, outside the kernel.

    w1: (in, hidden), b1: (hidden,), w2: (hidden, out), b2: (out,)
    returns: wf_pad (IN_PAD, OUT_PAD), bf_pad (1, OUT_PAD), out_size
    """
    in_size, _ = w1.shape
    out_size = w2.shape[1]
    hp = jax.lax.Precision.HIGHEST
    wf = jnp.dot(w1, w2, precision=hp)                             # (in, out)
    bf = jnp.dot(b1[None, :], w2, precision=hp) + b2[None, :]      # (1, out)
    in_pad = _round_up(in_size, _LANE)
    out_pad = _round_up(out_size, _LANE)
    wf_pad = jnp.zeros((in_pad, out_pad), wf.dtype).at[:in_size, :out_size].set(wf)
    bf_pad = jnp.zeros((1, out_pad), bf.dtype).at[:, :out_size].set(bf)
    return wf_pad, bf_pad, out_size


@functools.partial(jax.jit, static_argnames=("out_size", "batch_tile"))
def noise_generator_forward(noise, wf_pad, bf_pad, *, out_size, batch_tile=256):
    """noise: (B, in_size) -> (B, out_size) == tanh(fc2(fc1(noise)))."""
    B, in_size = noise.shape
    in_pad, out_pad = wf_pad.shape
    vmem = pltpu.MemorySpace.VMEM

    b_small = _round_up(B, _SUBLANE)
    if b_small <= batch_tile:
        # Overhead-bound tiny case: grid-less call, whole (padded) arrays in VMEM.
        x = jnp.zeros((b_small, in_pad), noise.dtype).at[:B, :in_size].set(noise)
        out = pl.pallas_call(
            _fused_mlp_kernel,
            out_shape=jax.ShapeDtypeStruct((b_small, out_pad), noise.dtype),
            in_specs=[pl.BlockSpec(memory_space=vmem)] * 3,
            out_specs=pl.BlockSpec(memory_space=vmem),
        )(x, wf_pad, bf_pad)
    else:
        # Throughput case: tile the batch, keep weights/bias VMEM-resident,
        # parallel batch axis (2x on v7x; no-op on single-TC v5e/v6e).
        b_pad = _round_up(B, batch_tile)
        x = jnp.zeros((b_pad, in_pad), noise.dtype).at[:B, :in_size].set(noise)
        out = pl.pallas_call(
            _fused_mlp_kernel,
            out_shape=jax.ShapeDtypeStruct((b_pad, out_pad), noise.dtype),
            grid=(b_pad // batch_tile,),
            in_specs=[
                pl.BlockSpec((batch_tile, in_pad), lambda i: (i, 0)),
                pl.BlockSpec((in_pad, out_pad), lambda i: (0, 0)),
                pl.BlockSpec((1, out_pad), lambda i: (0, 0)),
            ],
            out_specs=pl.BlockSpec((batch_tile, out_pad), lambda i: (i, 0)),
            compiler_params=pltpu.CompilerParams(
                dimension_semantics=("parallel",)),
        )(x, wf_pad, bf_pad)

    return out[:B, :out_size]


def _init_params(key, in_size, hidden_size, output_size, dtype=jnp.float32):
    """Mimics nn.Linear's uniform(-1/sqrt(fan_in), 1/sqrt(fan_in)) init.
    Weights stored as (in_features, out_features)."""
    k1, k2, k3, k4 = jax.random.split(key, 4)
    lim1 = 1.0 / (in_size ** 0.5)
    lim2 = 1.0 / (hidden_size ** 0.5)
    w1 = jax.random.uniform(k1, (in_size, hidden_size), dtype, -lim1, lim1)
    b1 = jax.random.uniform(k2, (hidden_size,), dtype, -lim1, lim1)
    w2 = jax.random.uniform(k3, (hidden_size, output_size), dtype, -lim2, lim2)
    b2 = jax.random.uniform(k4, (output_size,), dtype, -lim2, lim2)
    return w1, b1, w2, b2


def _reference(noise, w1, b1, w2, b2):
    hp = jax.lax.Precision.HIGHEST
    h = jnp.dot(noise, w1, precision=hp) + b1
    return jnp.tanh(jnp.dot(h, w2, precision=hp) + b2)


if __name__ == "__main__":
    B, IN, HID, OUT = 8, 16, 32, 16

    key = jax.random.PRNGKey(0)
    k_noise, k_params, k_big = jax.random.split(key, 3)
    noise = jax.random.normal(k_noise, (B, IN), jnp.float32)
    w1, b1, w2, b2 = _init_params(k_params, IN, HID, OUT)

    wf_pad, bf_pad, out_size = prepare_fused_params(w1, b1, w2, b2)

    # Small (grid-less) path.
    out = jax.block_until_ready(
        noise_generator_forward(noise, wf_pad, bf_pad, out_size=out_size))
    ref = _reference(noise, w1, b1, w2, b2)
    assert out.shape == (B, OUT)
    assert jnp.allclose(out, ref, atol=1e-4, rtol=1e-4), \
        float(jnp.max(jnp.abs(out - ref)))

    # Batched (gridded, parallel batch axis) path.
    big_noise = jax.random.normal(k_big, (1024, IN), jnp.float32)
    big_out = jax.block_until_ready(
        noise_generator_forward(big_noise, wf_pad, bf_pad, out_size=out_size))
    big_ref = _reference(big_noise, w1, b1, w2, b2)
    assert big_out.shape == (1024, OUT)
    assert jnp.allclose(big_out, big_ref, atol=1e-4, rtol=1e-4), \
        float(jnp.max(jnp.abs(big_out - big_ref)))

    print("KERNEL_OK")
</pallas_src>

<mosaic_0001>
module attributes {stable_mosaic.version = 11 : i64} {
  func.func @_fused_mlp_kernel(%arg0: memref<8x128xf32, #tpu.memory_space<vmem>>, %arg1: memref<128x128xf32, #tpu.memory_space<vmem>>, %arg2: memref<1x128xf32, #tpu.memory_space<vmem>>, %arg3: memref<8x128xf32, #tpu.memory_space<vmem>>) attributes {dimension_semantics = [], scalar_prefetch = 0 : i64, scratch_operands = 0 : i64, tpu.core_type = #tpu.core_type<tc>} {
    %c0 = arith.constant 0 : index
    %c0_0 = arith.constant 0 : index
    %0 = vector.load %arg0[%c0, %c0_0] : memref<8x128xf32, #tpu.memory_space<vmem>>, vector<8x128xf32>
    %c0_1 = arith.constant 0 : index
    %c0_2 = arith.constant 0 : index
    %1 = vector.load %arg1[%c0_1, %c0_2] : memref<128x128xf32, #tpu.memory_space<vmem>>, vector<128x128xf32>
    %cst = arith.constant dense<0.000000e+00> : vector<8x128xf32>
    %2 = tpu.matmul %0, %1, %cst {dimension_numbers = #tpu.dot_dimension_numbers<[1], [0], [0], [1], [0, 0, 1, 1], [], []>} : vector<8x128xf32>, vector<128x128xf32>, vector<8x128xf32> -> vector<8x128xf32>
    %c0_3 = arith.constant 0 : index
    %c0_4 = arith.constant 0 : index
    %3 = vector.load %arg2[%c0_3, %c0_4] : memref<1x128xf32, #tpu.memory_space<vmem>>, vector<1x128xf32>
    %4 = vector.broadcast %3 : vector<1x128xf32> to vector<8x128xf32>
    %5 = arith.addf %2, %4 : vector<8x128xf32>
    %6 = math.tanh %5 : vector<8x128xf32>
    %c0_5 = arith.constant 0 : index
    %c0_6 = arith.constant 0 : index
    %7 = vector.load %arg3[%c0_5, %c0_6] : memref<8x128xf32, #tpu.memory_space<vmem>>, vector<8x128xf32>
    tpu.vector_store %arg3[%c0_5, %c0_6], %6 {strides = array<i32>} : memref<8x128xf32, #tpu.memory_space<vmem>>, vector<8x128xf32>,
    return
  }
}

</mosaic_0001>

<bundles_post_ra>
// kernel: noise_generator_forward.1
= control target key start
LH: loop header
LB: loop body
LE: loop exit
PB: predicated region body
PF: predicated region fallthrough
CT: control target
= control target key end

     0   :  { %8 = vsyncpa [#allocation3], 0  ;;  %s283_s0 = inlined_call_operand.vmem [shape: f32[8,128], index: 0, kind: input, shape index: {}]   ;;  %s284_s1 = inlined_call_operand.hbm [shape: f32[128,128], index: 1, kind: input, shape index: {}]   ;;  %s285_s2 = inlined_call_operand.vmem [shape: f32[1,128], index: 2, kind: input, shape index: {}]   ;;  %s286_s3 = inlined_call_operand.hbm [shape: f32[8,128], index: 3, kind: output, shape index: {}]  }
   0x1   :  { %9 = vsyncpa [#allocation4], 0  ;;  %s245_s12 = smov [#allocation2]  }
   0x2   :  { %s17_s13 = sshll.u32 %s245_s12, 4  ;;  %s18_s13 = int_to_ptr.vmem [resolvable:$true] %s17_s13 }
   0x3   :  { %s209_s14 = scalar_lea.vmem %s18_s13, 2048  ;;  %p214_p1 = scmp.lt.s32.totalorder %s18_s13, %s18_s13 }
   0x4   :  { %p210_p0 = scmp.ne.s32.totalorder %s18_s13, %s209_s14  ;;  %p215_p2 = scmp.lt.s32.totalorder %s209_s14, %s209_s14 }
   0x6   :  { %p216_p3 = por %p215_p2, %p214_p1 }
   0x8   :  { %p217_p4 = pnand %p216_p3, %p210_p0 }
   0xa   :  { %220 = shalt.err (!%p217_p4)
}
   0xb   :  { %s246_s15 = smov 128   ;;  %s247_s16 = smov 8  }
   0xc   :  { %23 = dma.hbm_to_vmem [thread:$0]  %s284_s1, 2048, %s18_s13, [#allocation3], %s246_s15, %s246_s15, %s247_s16  }
   0xd   :  { %241 = dma.done.wait [#allocation3], 2048  }
   0xe   :  { %242 = vsyncadd [#allocation3], 4294965248  ;;  %v248_v0 = vmov 0.0   ;;  %vm249_vm0 = vmmov 0   ;;  %v45_v1 = vld [vmem:[#allocation2 + $0x78] sm:$0xff]  ;;  %v44_v2 = vld [vmem:[#allocation2 + $0x70] sm:$0xff] }
   0xf   :  { %158 = vmatprep.subr.mxu0 %v248_v0  ;;  %190 = vmatprep.mubr.msk.f32.mxu0 %vm249_vm0, %v248_v0  ;;  %v43_v3 = vld [vmem:[#allocation2 + $0x68] sm:$0xff]  ;;  %v42_v4 = vld [vmem:[#allocation2 + $0x60] sm:$0xff]  ;;  %v41_v5 = vld [vmem:[#allocation2 + $0x58] sm:$0xff]  ;;  %s250_s22 = smov [#allocation5]  }
  0x10   :  { %159 = vmatpush3.msra.mxu0 %v45_v1  ;;  %v40_v6 = vld [vmem:[#allocation2 + $0x50] sm:$0xff]  ;;  %v39_v7 = vld [vmem:[#allocation2 + $0x48] sm:$0xff]  ;;  %v38_v8 = vld [vmem:[#allocation2 + $0x40] sm:$0xff]  ;;  %s131_s23 = sshll.u32 %s250_s22, 4  ;;  %s132_s23 = int_to_ptr.vmem [resolvable:$true] %s131_s23 }
  0x11   :  { %160 = vmatprep.subr.mxu0 %v248_v0  ;;  %v37_v9 = vld [vmem:[#allocation2 + $0x38] sm:$0xff]  ;;  %v36_v10 = vld [vmem:[#allocation2 + $0x30] sm:$0xff]  ;;  %v35_v11 = vld [vmem:[#allocation2 + $0x28] sm:$0xff]  ;;  %s221_s24 = scalar_lea.vmem %s132_s23, 128  ;;  %p226_p6 = scmp.lt.s32.totalorder %s132_s23, %s132_s23 }
  0x12   :  { %161 = vmatpush3.msra.mxu0 %v44_v2  ;;  %v34_v12 = vld [vmem:[#allocation2 + $0x20] sm:$0xff]  ;;  %v33_v13 = vld [vmem:[#allocation2 + $0x18] sm:$0xff]  ;;  %v32_v14 = vld [vmem:[#allocation2 + $0x10] sm:$0xff]  ;;  %p222_p5 = scmp.ne.s32.totalorder %s132_s23, %s221_s24  ;;  %p227_p7 = scmp.lt.s32.totalorder %s221_s24, %s221_s24 }
  0x13   :  { %162 = vmatprep.subr.mxu0 %v248_v0  ;;  %v31_v15 = vld [vmem:[#allocation2 + $0x8] sm:$0xff]  ;;  %v30_v16 = vld [vmem:[#allocation2] sm:$0xff] }
  0x14   :  { %163 = vmatpush3.msra.mxu0 %v43_v3  ;;  %v29_v17 = vld [vmem:[%s283_s0] sm:$0xff]  ;;  %p228_p8 = por %p227_p7, %p226_p6 }
  0x15   :  { %164 = vmatprep.subr.mxu0 %v248_v0  ;;  %v140_v18 = vld [vmem:[%s285_s2] ss:$0 sm:$0xff] }
  0x16   :  { %165 = vmatpush3.msra.mxu0 %v42_v4  ;;  %p229_p9 = pnand %p228_p8, %p222_p5 }
  0x17   :  { %166 = vmatprep.subr.mxu0 %v248_v0 }
  0x18   :  { %167 = vmatpush3.msra.mxu0 %v41_v5 }
  0x19   :  { %168 = vmatprep.subr.mxu0 %v248_v0 }
  0x1a   :  { %169 = vmatpush3.msra.mxu0 %v40_v6 }
  0x1b   :  { %170 = vmatprep.subr.mxu0 %v248_v0 }
  0x1c   :  { %171 = vmatpush3.msra.mxu0 %v39_v7 }
  0x1d   :  { %172 = vmatprep.subr.mxu0 %v248_v0 }
  0x1e   :  { %173 = vmatpush3.msra.mxu0 %v38_v8 }
  0x1f   :  { %174 = vmatprep.subr.mxu0 %v248_v0 }
  0x20   :  { %175 = vmatpush3.msra.mxu0 %v37_v9 }
  0x21   :  { %176 = vmatprep.subr.mxu0 %v248_v0 }
  0x22   :  { %177 = vmatpush3.msra.mxu0 %v36_v10 }
  0x23   :  { %178 = vmatprep.subr.mxu0 %v248_v0 }
  0x24   :  { %179 = vmatpush3.msra.mxu0 %v35_v11 }
  0x25   :  { %180 = vmatprep.subr.mxu0 %v248_v0 }
  0x26   :  { %181 = vmatpush3.msra.mxu0 %v34_v12 }
  0x27   :  { %182 = vmatprep.subr.mxu0 %v248_v0 }
  0x28   :  { %183 = vmatpush3.msra.mxu0 %v33_v13 }
  0x29   :  { %184 = vmatprep.subr.mxu0 %v248_v0 }
  0x2a   :  { %185 = vmatpush3.msra.mxu0 %v32_v14 }
  0x2b   :  { %186 = vmatprep.subr.mxu0 %v248_v0 }
  0x2c   :  { %187 = vmatpush3.msra.mxu0 %v31_v15 }
  0x2d   :  { %188 = vmatprep.subr.mxu0 %v248_v0 }
  0x2e   :  { %189 = vmatpush3.msra.mxu0 %v30_v16 }
  0x2f   :  { %191 = vmatmul.mubr.f32.vlgmr.msra.gmra.mxu0 %v29_v17 }
  0xef   :  { %v119_v19 = vpop.f32.mrf.mxu0 }
  0xf0   :  { %v120_v20 = vadd.f32 %v140_v18, %v119_v19 }
  0xf1   :  { %v192_v21 = vpop.f32.mrf.mxu0 }
  0xf2   :  { %199 = vtanh.f32 %v120_v20 }
  0xff   :  { %v200_v22 = vpop.eup %199 }
 0x100   :  { %124 = vst [vmem:[#allocation5] sm:$0xff] %v200_v22 }
 0x101   :  { %232 = shalt.err (!%p229_p9)
}
 0x102   :  { %134 = dma.vmem_to_hbm [thread:$0]  %s132_s23, 128, %s286_s3, [#allocation4]  }
 0x103   :  { %243 = dma.done.wait [#allocation4], 128  }
 0x104   :  { %244 = vsyncadd [#allocation4], 4294967168 }
 0x105   :  { %138 = vsyncpa [#allocation3], 1 }
 0x106   :  { %139 = vsyncpa [#allocation4], 1 }

</bundles_post_ra>
